<compile_context>
chip_gen: v6e
topology: v6e:2x2x1
jax: 0.10.0
libtpu: 0.0.40
codegen_flags: <defaults>
</compile_context>

<pallas_src>
import jax
import jax.numpy as jnp
from jax.experimental import pallas as pl
from jax.experimental.pallas import tpu as pltpu


def rnn_kernel(x_ref, wxh_ref, whh_ref, why_ref, bh_ref, by_ref, out_ref, xw_ref):
    # x_ref:   (T*B, D)  time-major, flattened in the wrapper
    # why_ref: (H, O_pad), by_ref: (1, O_pad)  -- lane-dense (128-multiple) output
    # xw_ref:  (T, B, H)  VMEM scratch holding all pre-activations
    T, B, H = xw_ref.shape

    # ---- Hoisted input projection (off the serial h-dependence chain) ------
    # One (T*B, D) @ (D, H) matmul + a single bh add for all timesteps,
    # written time-major so each step's read is a leading-axis tile select.
    xw = jnp.dot(x_ref[...], wxh_ref[...], preferred_element_type=jnp.float32)
    xw_ref[...] = (xw + bh_ref[...]).reshape(T, B, H)

    # ---- Serial recurrence: only h @ Whh remains on the critical path ------
    whh = whh_ref[...]
    h = jnp.tanh(xw_ref[0])                       # h_0 = 0 => skip zero matmul
    for t in range(1, T):                         # T static & small: fully unrolled
        h = jnp.tanh(
            jnp.dot(h, whh, preferred_element_type=jnp.float32) + xw_ref[t]
        )

    # ---- Output projection (lane-dense (B, O_pad) store) -------------------
    out_ref[...] = (
        jnp.dot(h, why_ref[...], preferred_element_type=jnp.float32) + by_ref[...]
    ).astype(out_ref.dtype)


def vanilla_rnn_forward(x_btd, Wxh, Whh, Why, bh, by):
    """x_btd: (B, T, D) float32 -- PyTorch (batch, seq, input_dim) layout."""
    B, T, D = x_btd.shape
    H = Wxh.shape[1]
    O = Why.shape[1]

    if T == 0:  # degenerate: h stays 0, so out = by broadcast over batch
        return jnp.broadcast_to(by.reshape(1, O), (B, O)).astype(jnp.float32)

    # Lane-dense output width (multiple of 128): pad Why / by with zero cols.
    O_pad = ((O + 127) // 128) * 128
    Why_p = jnp.pad(Why.astype(jnp.float32), ((0, 0), (0, O_pad - O)))
    by_p = jnp.pad(by.astype(jnp.float32).reshape(1, O), ((0, 0), (0, O_pad - O)))
    bh2 = bh.reshape(1, H).astype(jnp.float32)

    # Time-major flatten done on the HBM array in the wrapper (free layout
    # plumbing in XLA; kernel consumes the exact (T*B, D) slab it computes on).
    x_flat = jnp.transpose(x_btd, (1, 0, 2)).reshape(T * B, D).astype(jnp.float32)

    vmem_spec = lambda: pl.BlockSpec(memory_space=pltpu.MemorySpace.VMEM)
    out_p = pl.pallas_call(
        rnn_kernel,
        out_shape=jax.ShapeDtypeStruct((B, O_pad), jnp.float32),
        in_specs=[vmem_spec() for _ in range(6)],   # whole arrays resident in VMEM
        out_specs=vmem_spec(),
        scratch_shapes=[pltpu.VMEM((T, B, H), jnp.float32)],
    )(x_flat, Wxh, Whh, Why_p, bh2, by_p)

    return out_p[:, :O]


def vanilla_rnn_reference(x_btd, Wxh, Whh, Why, bh, by):
    B, T, D = x_btd.shape
    H = Wxh.shape[1]
    h = jnp.zeros((B, H), jnp.float32)
    for t in range(T):
        h = jnp.tanh(x_btd[:, t, :] @ Wxh + h @ Whh + bh)
    return h @ Why + by


if __name__ == "__main__":
    # Module hyperparameters (small, consistent with the forward pass).
    input_length = 8    # T
    input_dim = 16      # D
    hidden_dim = 32     # H
    output_dim = 10     # O
    batch = 8           # B

    key = jax.random.PRNGKey(0)
    kx, kwxh, kwhh, kwhy = jax.random.split(key, 4)

    # Deterministic parameter init matching torch.randn / torch.zeros shapes.
    Wxh = jax.random.normal(kwxh, (input_dim, hidden_dim), jnp.float32)
    Whh = jax.random.normal(kwhh, (hidden_dim, hidden_dim), jnp.float32)
    Why = jax.random.normal(kwhy, (hidden_dim, output_dim), jnp.float32)
    bh = jnp.zeros((hidden_dim,), jnp.float32)
    by = jnp.zeros((output_dim,), jnp.float32)

    # Input in PyTorch layout (batch, seq, input_dim).
    x = jax.random.normal(kx, (batch, input_length, input_dim), jnp.float32)

    out = vanilla_rnn_forward(x, Wxh, Whh, Why, bh, by)
    out = jax.block_until_ready(out)

    ref = vanilla_rnn_reference(x, Wxh, Whh, Why, bh, by)
    assert out.shape == (batch, output_dim)
    assert jnp.allclose(out, ref, atol=1e-4, rtol=1e-4), "mismatch vs reference"

    print("KERNEL_OK")
</pallas_src>

<mosaic_0001>
module attributes {stable_mosaic.version = 11 : i64} {
  func.func @rnn_kernel(%arg0: memref<64x16xf32, #tpu.memory_space<vmem>>, %arg1: memref<16x32xf32, #tpu.memory_space<vmem>>, %arg2: memref<32x32xf32, #tpu.memory_space<vmem>>, %arg3: memref<32x128xf32, #tpu.memory_space<vmem>>, %arg4: memref<1x32xf32, #tpu.memory_space<vmem>>, %arg5: memref<1x128xf32, #tpu.memory_space<vmem>>, %arg6: memref<8x128xf32, #tpu.memory_space<vmem>>, %arg7: memref<8x8x32xf32, #tpu.memory_space<vmem>>) attributes {dimension_semantics = [], scalar_prefetch = 0 : i64, scratch_operands = 1 : i64, tpu.core_type = #tpu.core_type<tc>} {
    %c0 = arith.constant 0 : index
    %c0_0 = arith.constant 0 : index
    %0 = vector.load %arg0[%c0, %c0_0] : memref<64x16xf32, #tpu.memory_space<vmem>>, vector<64x16xf32>
    %c0_1 = arith.constant 0 : index
    %c0_2 = arith.constant 0 : index
    %1 = vector.load %arg1[%c0_1, %c0_2] : memref<16x32xf32, #tpu.memory_space<vmem>>, vector<16x32xf32>
    %cst = arith.constant dense<0.000000e+00> : vector<64x32xf32>
    %2 = tpu.matmul %0, %1, %cst {dimension_numbers = #tpu.dot_dimension_numbers<[1], [0], [0], [1], [0, 0, 1, 1], [], []>} : vector<64x16xf32>, vector<16x32xf32>, vector<64x32xf32> -> vector<64x32xf32>
    %c0_3 = arith.constant 0 : index
    %c0_4 = arith.constant 0 : index
    %3 = vector.load %arg4[%c0_3, %c0_4] : memref<1x32xf32, #tpu.memory_space<vmem>>, vector<1x32xf32>
    %4 = vector.broadcast %3 : vector<1x32xf32> to vector<64x32xf32>
    %5 = arith.addf %2, %4 : vector<64x32xf32>
    %6 = vector.shape_cast %5 : vector<64x32xf32> to vector<8x8x32xf32>
    %c0_5 = arith.constant 0 : index
    %c0_6 = arith.constant 0 : index
    %c0_7 = arith.constant 0 : index
    %7 = vector.load %arg7[%c0_5, %c0_6, %c0_7] : memref<8x8x32xf32, #tpu.memory_space<vmem>>, vector<8x8x32xf32>
    tpu.vector_store %arg7[%c0_5, %c0_6, %c0_7], %6 {strides = array<i32>} : memref<8x8x32xf32, #tpu.memory_space<vmem>>, vector<8x8x32xf32>,
    %c0_8 = arith.constant 0 : index
    %c0_9 = arith.constant 0 : index
    %8 = vector.load %arg2[%c0_8, %c0_9] : memref<32x32xf32, #tpu.memory_space<vmem>>, vector<32x32xf32>
    %c0_10 = arith.constant 0 : index
    %c0_11 = arith.constant 0 : index
    %c0_12 = arith.constant 0 : index
    %9 = vector.load %arg7[%c0_10, %c0_11, %c0_12] : memref<8x8x32xf32, #tpu.memory_space<vmem>>, vector<1x8x32xf32>
    %10 = vector.shape_cast %9 : vector<1x8x32xf32> to vector<8x32xf32>
    %11 = math.tanh %10 : vector<8x32xf32>
    %cst_13 = arith.constant dense<0.000000e+00> : vector<8x32xf32>
    %12 = tpu.matmul %11, %8, %cst_13 {dimension_numbers = #tpu.dot_dimension_numbers<[1], [0], [0], [1], [0, 0, 1, 1], [], []>} : vector<8x32xf32>, vector<32x32xf32>, vector<8x32xf32> -> vector<8x32xf32>
    %c1 = arith.constant 1 : index
    %c0_14 = arith.constant 0 : index
    %c0_15 = arith.constant 0 : index
    %13 = vector.load %arg7[%c1, %c0_14, %c0_15] : memref<8x8x32xf32, #tpu.memory_space<vmem>>, vector<1x8x32xf32>
    %14 = vector.shape_cast %13 : vector<1x8x32xf32> to vector<8x32xf32>
    %15 = arith.addf %12, %14 : vector<8x32xf32>
    %16 = math.tanh %15 : vector<8x32xf32>
    %cst_16 = arith.constant dense<0.000000e+00> : vector<8x32xf32>
    %17 = tpu.matmul %16, %8, %cst_16 {dimension_numbers = #tpu.dot_dimension_numbers<[1], [0], [0], [1], [0, 0, 1, 1], [], []>} : vector<8x32xf32>, vector<32x32xf32>, vector<8x32xf32> -> vector<8x32xf32>
    %c2 = arith.constant 2 : index
    %c0_17 = arith.constant 0 : index
    %c0_18 = arith.constant 0 : index
    %18 = vector.load %arg7[%c2, %c0_17, %c0_18] : memref<8x8x32xf32, #tpu.memory_space<vmem>>, vector<1x8x32xf32>
    %19 = vector.shape_cast %18 : vector<1x8x32xf32> to vector<8x32xf32>
    %20 = arith.addf %17, %19 : vector<8x32xf32>
    %21 = math.tanh %20 : vector<8x32xf32>
    %cst_19 = arith.constant dense<0.000000e+00> : vector<8x32xf32>
    %22 = tpu.matmul %21, %8, %cst_19 {dimension_numbers = #tpu.dot_dimension_numbers<[1], [0], [0], [1], [0, 0, 1, 1], [], []>} : vector<8x32xf32>, vector<32x32xf32>, vector<8x32xf32> -> vector<8x32xf32>
    %c3 = arith.constant 3 : index
    %c0_20 = arith.constant 0 : index
    %c0_21 = arith.constant 0 : index
    %23 = vector.load %arg7[%c3, %c0_20, %c0_21] : memref<8x8x32xf32, #tpu.memory_space<vmem>>, vector<1x8x32xf32>
    %24 = vector.shape_cast %23 : vector<1x8x32xf32> to vector<8x32xf32>
    %25 = arith.addf %22, %24 : vector<8x32xf32>
    %26 = math.tanh %25 : vector<8x32xf32>
    %cst_22 = arith.constant dense<0.000000e+00> : vector<8x32xf32>
    %27 = tpu.matmul %26, %8, %cst_22 {dimension_numbers = #tpu.dot_dimension_numbers<[1], [0], [0], [1], [0, 0, 1, 1], [], []>} : vector<8x32xf32>, vector<32x32xf32>, vector<8x32xf32> -> vector<8x32xf32>
    %c4 = arith.constant 4 : index
    %c0_23 = arith.constant 0 : index
    %c0_24 = arith.constant 0 : index
    %28 = vector.load %arg7[%c4, %c0_23, %c0_24] : memref<8x8x32xf32, #tpu.memory_space<vmem>>, vector<1x8x32xf32>
    %29 = vector.shape_cast %28 : vector<1x8x32xf32> to vector<8x32xf32>
    %30 = arith.addf %27, %29 : vector<8x32xf32>
    %31 = math.tanh %30 : vector<8x32xf32>
    %cst_25 = arith.constant dense<0.000000e+00> : vector<8x32xf32>
    %32 = tpu.matmul %31, %8, %cst_25 {dimension_numbers = #tpu.dot_dimension_numbers<[1], [0], [0], [1], [0, 0, 1, 1], [], []>} : vector<8x32xf32>, vector<32x32xf32>, vector<8x32xf32> -> vector<8x32xf32>
    %c5 = arith.constant 5 : index
    %c0_26 = arith.constant 0 : index
    %c0_27 = arith.constant 0 : index
    %33 = vector.load %arg7[%c5, %c0_26, %c0_27] : memref<8x8x32xf32, #tpu.memory_space<vmem>>, vector<1x8x32xf32>
    %34 = vector.shape_cast %33 : vector<1x8x32xf32> to vector<8x32xf32>
    %35 = arith.addf %32, %34 : vector<8x32xf32>
    %36 = math.tanh %35 : vector<8x32xf32>
    %cst_28 = arith.constant dense<0.000000e+00> : vector<8x32xf32>
    %37 = tpu.matmul %36, %8, %cst_28 {dimension_numbers = #tpu.dot_dimension_numbers<[1], [0], [0], [1], [0, 0, 1, 1], [], []>} : vector<8x32xf32>, vector<32x32xf32>, vector<8x32xf32> -> vector<8x32xf32>
    %c6 = arith.constant 6 : index
    %c0_29 = arith.constant 0 : index
    %c0_30 = arith.constant 0 : index
    %38 = vector.load %arg7[%c6, %c0_29, %c0_30] : memref<8x8x32xf32, #tpu.memory_space<vmem>>, vector<1x8x32xf32>
    %39 = vector.shape_cast %38 : vector<1x8x32xf32> to vector<8x32xf32>
    %40 = arith.addf %37, %39 : vector<8x32xf32>
    %41 = math.tanh %40 : vector<8x32xf32>
    %cst_31 = arith.constant dense<0.000000e+00> : vector<8x32xf32>
    %42 = tpu.matmul %41, %8, %cst_31 {dimension_numbers = #tpu.dot_dimension_numbers<[1], [0], [0], [1], [0, 0, 1, 1], [], []>} : vector<8x32xf32>, vector<32x32xf32>, vector<8x32xf32> -> vector<8x32xf32>
    %c7 = arith.constant 7 : index
    %c0_32 = arith.constant 0 : index
    %c0_33 = arith.constant 0 : index
    %43 = vector.load %arg7[%c7, %c0_32, %c0_33] : memref<8x8x32xf32, #tpu.memory_space<vmem>>, vector<1x8x32xf32>
    %44 = vector.shape_cast %43 : vector<1x8x32xf32> to vector<8x32xf32>
    %45 = arith.addf %42, %44 : vector<8x32xf32>
    %46 = math.tanh %45 : vector<8x32xf32>
    %c0_34 = arith.constant 0 : index
    %c0_35 = arith.constant 0 : index
    %47 = vector.load %arg3[%c0_34, %c0_35] : memref<32x128xf32, #tpu.memory_space<vmem>>, vector<32x128xf32>
    %cst_36 = arith.constant dense<0.000000e+00> : vector<8x128xf32>
    %48 = tpu.matmul %46, %47, %cst_36 {dimension_numbers = #tpu.dot_dimension_numbers<[1], [0], [0], [1], [0, 0, 1, 1], [], []>} : vector<8x32xf32>, vector<32x128xf32>, vector<8x128xf32> -> vector<8x128xf32>
    %c0_37 = arith.constant 0 : index
    %c0_38 = arith.constant 0 : index
    %49 = vector.load %arg5[%c0_37, %c0_38] : memref<1x128xf32, #tpu.memory_space<vmem>>, vector<1x128xf32>
    %50 = vector.broadcast %49 : vector<1x128xf32> to vector<8x128xf32>
    %51 = arith.addf %48, %50 : vector<8x128xf32>
    %c0_39 = arith.constant 0 : index
    %c0_40 = arith.constant 0 : index
    %52 = vector.load %arg6[%c0_39, %c0_40] : memref<8x128xf32, #tpu.memory_space<vmem>>, vector<8x128xf32>
    tpu.vector_store %arg6[%c0_39, %c0_40], %51 {strides = array<i32>} : memref<8x128xf32, #tpu.memory_space<vmem>>, vector<8x128xf32>,
    return
  }
}

</mosaic_0001>

<bundles_post_ra>
// kernel: tpu_custom_call.1
= control target key start
LH: loop header
LB: loop body
LE: loop exit
PB: predicated region body
PF: predicated region fallthrough
CT: control target
= control target key end

     0   :  { %vm41_vm0 = vcmask 130048   ;;  %s1249_s0 = inlined_call_operand.vmem [shape: f32[64,16], index: 0, kind: input, shape index: {}]   ;;  %s1250_s1 = inlined_call_operand.vmem [shape: f32[16,32], index: 1, kind: input, shape index: {}]   ;;  %s1251_s2 = inlined_call_operand.vmem [shape: f32[32,32], index: 2, kind: input, shape index: {}]   ;;  %s1252_s3 = inlined_call_operand.vmem [shape: f32[32,128], index: 3, kind: input, shape index: {}]   ;;  %s1253_s4 = inlined_call_operand.vmem [shape: f32[1,32], index: 4, kind: input, shape index: {}]   ;;  %s1254_s5 = inlined_call_operand.vmem [shape: f32[1,128], index: 5, kind: input, shape index: {}]   ;;  %s1255_s6 = inlined_call_operand.hbm [shape: f32[8,128], index: 6, kind: output, shape index: {}]  }
   0x1   :  { %v33_v0 = vld [vmem:[%s1250_s1 + $0x8] sm:$0xff]  ;;  %v32_v1 = vld [vmem:[%s1250_s1] sm:$0xff] }
   0x2   :  { %v24_v2 = vld [vmem:[%s1249_s0] sm:$0xff]  ;;  %885 = vmatprep.subr.mxu0 %v33_v0 }
   0x3   :  { %889 = vmatprep.mubr.msk.f32.mxu0 %vm41_vm0, %v24_v2 }
   0x4   :  { %11 = vsyncpa [#allocation4], 0  ;;  %886 = vmatpush3.msra.mxu0 %v33_v0  ;;  %v25_v3 = vld [vmem:[%s1249_s0 + $0x8] sm:$0xff]  ;;  %v1085_v4 = vld [vmem:[%s1251_s2 + $0x18] sm:$0xff]  ;;  %v1030_v5 = vmov 0.0   ;;  %vm1031_vm1 = vmmov 0  }
   0x5   :  { %887 = vmatprep.subr.mxu0 %v32_v1  ;;  %901 = vmatprep.subr.mxu1 %v1030_v5  ;;  %v1091_v6 = vld [vmem:[%s1251_s2 + $0x10] sm:$0xff]  ;;  %v1101_v7 = vld [vmem:[%s1251_s2 + $0x8] sm:$0xff]  ;;  %v1110_v8 = vld [vmem:[%s1251_s2] sm:$0xff]  ;;  %vm171_vm2 = vcmask 261120   ;;  %s1032_s8 = smov [#allocation3]  }
   0x6   :  { %888 = vmatpush3.msra.mxu0 %v32_v1  ;;  %909 = vmatprep.mubr.msk.f32.mxu1 %vm1031_vm1, %v1030_v5  ;;  %v1125_v9 = vld [vmem:[%s1253_s4] ss:$0 sm:$0xff]  ;;  %v26_v16 = vld [vmem:[%s1249_s0 + $0x10] sm:$0xff]  ;;  %v27_v17 = vld [vmem:[%s1249_s0 + $0x18] sm:$0xff]  ;;  %s809_s9 = sshll.u32 %s1032_s8, 4  ;;  %s810_s9 = int_to_ptr.vmem [resolvable:$true] %s809_s9 }
   0x7   :  { %890 = vmatmul.mubr.msk.f32.vlgmr.msra.gmra.mxu0 %vm41_vm0, %v25_v3  ;;  %902 = vmatpush3.msra.mxu1 %v1085_v4  ;;  %v28_v27 = vld [vmem:[%s1249_s0 + $0x20] sm:$0xff]  ;;  %v29_v28 = vld [vmem:[%s1249_s0 + $0x28] sm:$0xff]  ;;  %v30_v29 = vld [vmem:[%s1249_s0 + $0x30] sm:$0xff]  ;;  %p1013_p1 = scmp.lt.s32.totalorder %s810_s9, %s810_s9 }
   0x8   :  { %923 = vmatprep.subr.mxu0 %v1030_v5  ;;  %903 = vmatprep.subr.mxu1 %v1030_v5  ;;  %v31_v30 = vld [vmem:[%s1249_s0 + $0x38] sm:$0xff]  ;;  %v720_v1 = vld [vmem:[%s1252_s3 + $0x10] sm:$0xff]  ;;  %v719_v2 = vld [vmem:[%s1252_s3 + $0x8] sm:$0xff] }
   0x9   :  { %924 = vmatpush3.msra.mxu0 %v1085_v4  ;;  %904 = vmatpush3.msra.mxu1 %v1091_v6  ;;  %v721_v0 = vld [vmem:[%s1252_s3 + $0x18] sm:$0xff]  ;;  %v718_v3 = vld [vmem:[%s1252_s3] sm:$0xff]  ;;  %s1008_s3 = scalar_lea.vmem %s810_s9, 128 }
   0xa   :  { %925 = vmatprep.subr.mxu0 %v1030_v5  ;;  %905 = vmatprep.subr.mxu1 %v1030_v5  ;;  %p1009_p0 = scmp.ne.s32.totalorder %s810_s9, %s1008_s3  ;;  %p1014_p2 = scmp.lt.s32.totalorder %s1008_s3, %s1008_s3 }
   0xb   :  { %926 = vmatpush3.msra.mxu0 %v1091_v6  ;;  %906 = vmatpush3.msra.mxu1 %v1101_v7 }
   0xc   :  { %927 = vmatprep.subr.mxu0 %v1030_v5  ;;  %907 = vmatprep.subr.mxu1 %v1030_v5  ;;  %p1015_p3 = por %p1014_p2, %p1013_p1 }
   0xd   :  { %928 = vmatpush3.msra.mxu0 %v1101_v7  ;;  %908 = vmatpush3.msra.mxu1 %v1110_v8 }
   0xe   :  { %929 = vmatprep.subr.mxu0 %v1030_v5  ;;  %912 = vmatprep.subr.mxu1 %v1030_v5  ;;  %p1016_p4 = pnand %p1015_p3, %p1009_p0 }
   0xf   :  { %930 = vmatpush3.msra.mxu0 %v1110_v8  ;;  %892 = vmatprep.mubr.msk.f32.mxu0 %vm41_vm0, %v26_v16 }
  0x10   :  { %945 = vmatprep.subr.mxu0 %v1030_v5  ;;  %893 = vmatmul.mubr.msk.f32.gmra.mxu0 %vm41_vm0, %v27_v17 }
  0x11   :  { %895 = vmatprep.mubr.msk.f32.mxu0 %vm41_vm0, %v28_v27 }
  0x14   :  { %896 = vmatmul.mubr.msk.f32.gmra.mxu0 %vm41_vm0, %v29_v28 }
  0x15   :  { %898 = vmatprep.mubr.msk.f32.mxu0 %vm41_vm0, %v30_v29 }
  0x18   :  { %899 = vmatmul.mubr.msk.f32.gmra.mxu0 %vm41_vm0, %v31_v30 }
  0x19   :  { %931 = vmatprep.mubr.msk.f32.mxu0 %vm1031_vm1, %v1030_v5 }
  0xc7   :  { %v891_v10 = vpop.f32.mrf.mxu0 }
  0xc8   :  { %v138_v11 = vadd.f32 %v891_v10, %v1125_v9  ;;  %v833_v10 = vld [vmem:[%s1254_s5] ss:$0 sm:$0xff] }
  0xc9   :  { %v132_v12 = vpop.f32.mrf.mxu0 }
  0xca   :  { %173 = vst.msk [vmem:[#allocation2 + $0x8] sm:$0xff] %vm171_vm2, %v138_v11  ;;  %v133_v13 = vadd.f32 %v1125_v9, %v132_v12 }
  0xcc   :  { %172 = vst.msk [vmem:[#allocation2] sm:$0xff] %vm171_vm2, %v133_v13 }
  0xd0   :  { %v894_v23 = vpop.f32.mrf.mxu0 }
  0xd1   :  { %v187_v18 = vld [vmem:[#allocation2 + $0x8] sm:$0xff]  ;;  %v148_v24 = vadd.f32 %v894_v23, %v1125_v9 }
  0xd2   :  { %v142_v25 = vpop.f32.mrf.mxu0 }
  0xd3   :  { %v184_v14 = vld [vmem:[#allocation2] sm:$0xff]  ;;  %175 = vst.msk [vmem:[#allocation2 + $0x18] sm:$0xff] %vm171_vm2, %v148_v24  ;;  %v143_v26 = vadd.f32 %v1125_v9, %v142_v25 }
  0xd4   :  { %992 = vtanh.f32 %v184_v14  ;;  %v897_v36 = vpop.f32.mrf.mxu0 }
  0xd5   :  { %174 = vst.msk [vmem:[#allocation2 + $0x10] sm:$0xff] %vm171_vm2, %v143_v26  ;;  %v158_v37 = vadd.f32 %v897_v36, %v1125_v9 }
  0xd6   :  { %v152_v38 = vpop.f32.mrf.mxu0 }
  0xd7   :  { %177 = vst.msk [vmem:[#allocation2 + $0x28] sm:$0xff] %vm171_vm2, %v158_v37  ;;  %v153_v39 = vadd.f32 %v1125_v9, %v152_v38 }
  0xd8   :  { %v900_v40 = vpop.f32.mrf.mxu0 }
  0xd9   :  { %176 = vst.msk [vmem:[#allocation2 + $0x20] sm:$0xff] %vm171_vm2, %v153_v39  ;;  %v168_v41 = vadd.f32 %v900_v40, %v1125_v9 }
  0xda   :  { %v162_v42 = vpop.f32.mrf.mxu0  ;;  %v339_v44 = vld [vmem:[#allocation2 + $0x18] sm:$0xff] }
  0xdb   :  { %179 = vst.msk [vmem:[#allocation2 + $0x38] sm:$0xff] %vm171_vm2, %v168_v41  ;;  %v163_v43 = vadd.f32 %v1125_v9, %v162_v42 }
  0xdc   :  { %v263_v31 = vld [vmem:[#allocation2 + $0x10] sm:$0xff] }
  0xdd   :  { %178 = vst.msk [vmem:[#allocation2 + $0x30] sm:$0xff] %vm171_vm2, %v163_v43 }
  0xde   :  { %v491_v54 = vld [vmem:[#allocation2 + $0x28] sm:$0xff] }
  0xe0   :  { %v415_v49 = vld [vmem:[#allocation2 + $0x20] sm:$0xff] }
  0xe1   :  { %v993_v15 = vpop.eup %992 }
  0xe2   :  { %910 = vmatmul.mubr.msk.f32.vlgmr.msra.gmra.mxu1 %vm171_vm2, %v993_v15 }
  0xe3   :  { %913 = vmatpush3.msra.mxu1 %v1085_v4  ;;  %920 = vmatprep.mubr.msk.f32.mxu1 %vm1031_vm1, %v1030_v5 }
  0xe4   :  { %914 = vmatprep.subr.mxu1 %v1030_v5  ;;  %v567_v59 = vld [vmem:[#allocation2 + $0x30] sm:$0xff] }
  0xe5   :  { %915 = vmatpush3.msra.mxu1 %v1091_v6 }
  0xe6   :  { %916 = vmatprep.subr.mxu1 %v1030_v5 }
  0xe7   :  { %917 = vmatpush3.msra.mxu1 %v1101_v7 }
  0xe8   :  { %918 = vmatprep.subr.mxu1 %v1030_v5 }
  0xe9   :  { %919 = vmatpush3.msra.mxu1 %v1110_v8 }
  0xea   :  { %934 = vmatprep.subr.mxu1 %v1030_v5 }
 0x1a2   :  { %v257_v19 = vpop.f32.mrf.mxu1 }
 0x1a3   :  { %v258_v20 = vadd.f32 %v257_v19, %v187_v18 }
 0x1a4   :  { %v911_v21 = vpop.f32.mrf.mxu1 }
 0x1a5   :  { %994 = vtanh.f32 %v258_v20 }
 0x1b2   :  { %v995_v22 = vpop.eup %994 }
 0x1b3   :  { %921 = vmatmul.mubr.msk.f32.vlgmr.msra.gmra.mxu1 %vm171_vm2, %v995_v22 }
 0x1b4   :  { %935 = vmatpush3.msra.mxu1 %v1085_v4  ;;  %942 = vmatprep.mubr.msk.f32.mxu1 %vm1031_vm1, %v1030_v5 }
 0x1b5   :  { %936 = vmatprep.subr.mxu1 %v1030_v5 }
 0x1b6   :  { %937 = vmatpush3.msra.mxu1 %v1091_v6 }
 0x1b7   :  { %938 = vmatprep.subr.mxu1 %v1030_v5 }
 0x1b8   :  { %939 = vmatpush3.msra.mxu1 %v1101_v7 }
 0x1b9   :  { %940 = vmatprep.subr.mxu1 %v1030_v5 }
 0x1ba   :  { %941 = vmatpush3.msra.mxu1 %v1110_v8 }
 0x1bb   :  { %956 = vmatprep.subr.mxu1 %v1030_v5 }
 0x273   :  { %v333_v32 = vpop.f32.mrf.mxu1 }
 0x274   :  { %v334_v33 = vadd.f32 %v333_v32, %v263_v31 }
 0x275   :  { %v922_v34 = vpop.f32.mrf.mxu1 }
 0x276   :  { %996 = vtanh.f32 %v334_v33 }
 0x283   :  { %v997_v35 = vpop.eup %996 }
 0x284   :  { %932 = vmatmul.mubr.msk.f32.vlgmr.msra.gmra.mxu0 %vm171_vm2, %v997_v35 }
 0x285   :  { %946 = vmatpush3.msra.mxu0 %v1085_v4  ;;  %953 = vmatprep.mubr.msk.f32.mxu0 %vm1031_vm1, %v1030_v5 }
 0x286   :  { %947 = vmatprep.subr.mxu0 %v1030_v5 }
 0x287   :  { %948 = vmatpush3.msra.mxu0 %v1091_v6 }
 0x288   :  { %949 = vmatprep.subr.mxu0 %v1030_v5 }
 0x289   :  { %950 = vmatpush3.msra.mxu0 %v1101_v7 }
 0x28a   :  { %951 = vmatprep.subr.mxu0 %v1030_v5 }
 0x28b   :  { %952 = vmatpush3.msra.mxu0 %v1110_v8 }
 0x28c   :  { %967 = vmatprep.subr.mxu0 %v1030_v5 }
 0x344   :  { %v409_v45 = vpop.f32.mrf.mxu0 }
 0x345   :  { %v410_v46 = vadd.f32 %v409_v45, %v339_v44 }
 0x346   :  { %v933_v47 = vpop.f32.mrf.mxu0 }
 0x347   :  { %998 = vtanh.f32 %v410_v46 }
 0x354   :  { %v999_v48 = vpop.eup %998 }
 0x355   :  { %943 = vmatmul.mubr.msk.f32.vlgmr.msra.gmra.mxu1 %vm171_vm2, %v999_v48 }
 0x356   :  { %957 = vmatpush3.msra.mxu1 %v1085_v4  ;;  %964 = vmatprep.mubr.msk.f32.mxu1 %vm1031_vm1, %v1030_v5 }
 0x357   :  { %958 = vmatprep.subr.mxu1 %v1030_v5 }
 0x358   :  { %959 = vmatpush3.msra.mxu1 %v1091_v6 }
 0x359   :  { %960 = vmatprep.subr.mxu1 %v1030_v5 }
 0x35a   :  { %961 = vmatpush3.msra.mxu1 %v1101_v7 }
 0x35b   :  { %962 = vmatprep.subr.mxu1 %v1030_v5 }
 0x35c   :  { %963 = vmatpush3.msra.mxu1 %v1110_v8 }
 0x35d   :  { %978 = vmatprep.subr.mxu1 %v1030_v5 }
 0x415   :  { %v485_v50 = vpop.f32.mrf.mxu1 }
 0x416   :  { %v486_v51 = vadd.f32 %v485_v50, %v415_v49 }
 0x417   :  { %v944_v52 = vpop.f32.mrf.mxu1 }
 0x418   :  { %1000 = vtanh.f32 %v486_v51 }
 0x425   :  { %v1001_v53 = vpop.eup %1000 }
 0x426   :  { %954 = vmatmul.mubr.msk.f32.vlgmr.msra.gmra.mxu0 %vm171_vm2, %v1001_v53 }
 0x427   :  { %968 = vmatpush3.msra.mxu0 %v1085_v4  ;;  %975 = vmatprep.mubr.msk.f32.mxu0 %vm1031_vm1, %v1030_v5  ;;  %v643_v4 = vld [vmem:[#allocation2 + $0x38] sm:$0xff] }
 0x428   :  { %969 = vmatprep.subr.mxu0 %v1030_v5 }
 0x429   :  { %970 = vmatpush3.msra.mxu0 %v1091_v6 }
 0x42a   :  { %971 = vmatprep.subr.mxu0 %v1030_v5 }
 0x42b   :  { %972 = vmatpush3.msra.mxu0 %v1101_v7 }
 0x42c   :  { %973 = vmatprep.subr.mxu0 %v1030_v5 }
 0x42d   :  { %974 = vmatpush3.msra.mxu0 %v1110_v8 }
 0x4e6   :  { %v561_v55 = vpop.f32.mrf.mxu0 }
 0x4e7   :  { %v562_v56 = vadd.f32 %v561_v55, %v491_v54 }
 0x4e8   :  { %v955_v57 = vpop.f32.mrf.mxu0 }
 0x4e9   :  { %1002 = vtanh.f32 %v562_v56 }
 0x4f6   :  { %v1003_v58 = vpop.eup %1002 }
 0x4f7   :  { %965 = vmatmul.mubr.msk.f32.vlgmr.msra.gmra.mxu1 %vm171_vm2, %v1003_v58 }
 0x4f8   :  { %986 = vmatprep.mubr.msk.f32.mxu1 %vm1031_vm1, %v1030_v5  ;;  %979 = vmatpush3.msra.mxu1 %v721_v0 }
 0x4f9   :  { %980 = vmatprep.subr.mxu1 %v1030_v5 }
 0x4fa   :  { %981 = vmatpush3.msra.mxu1 %v720_v1 }
 0x4fb   :  { %982 = vmatprep.subr.mxu1 %v1030_v5 }
 0x4fc   :  { %983 = vmatpush3.msra.mxu1 %v719_v2 }
 0x4fd   :  { %984 = vmatprep.subr.mxu1 %v1030_v5 }
 0x4fe   :  { %985 = vmatpush3.msra.mxu1 %v718_v3 }
 0x5b7   :  { %v637_v60 = vpop.f32.mrf.mxu1 }
 0x5b8   :  { %v638_v61 = vadd.f32 %v637_v60, %v567_v59 }
 0x5b9   :  { %v966_v62 = vpop.f32.mrf.mxu1 }
 0x5ba   :  { %1004 = vtanh.f32 %v638_v61 }
 0x5c7   :  { %v1005_v63 = vpop.eup %1004 }
 0x5c8   :  { %976 = vmatmul.mubr.msk.f32.vlgmr.msra.gmra.mxu0 %vm171_vm2, %v1005_v63 }
 0x688   :  { %v713_v6 = vpop.f32.mrf.mxu0 }
 0x689   :  { %v714_v7 = vadd.f32 %v713_v6, %v643_v4 }
 0x68a   :  { %v977_v8 = vpop.f32.mrf.mxu0 }
 0x68b   :  { %1006 = vtanh.f32 %v714_v7 }
 0x698   :  { %v1007_v9 = vpop.eup %1006 }
 0x699   :  { %987 = vmatmul.mubr.msk.f32.vlgmr.msra.gmra.mxu1 %vm171_vm2, %v1007_v9 }
 0x759   :  { %v798_v11 = vpop.f32.mrf.mxu1 }
 0x75a   :  { %v799_v12 = vadd.f32 %v833_v10, %v798_v11 }
 0x75b   :  { %v988_v13 = vpop.f32.mrf.mxu1 }
 0x75c   :  { %802 = vst [vmem:[#allocation3] sm:$0xff] %v799_v12 }
 0x75d   :  { %1019 = shalt.err (!%p1016_p4)
}
 0x75e   :  { %812 = dma.vmem_to_hbm [thread:$0]  %s810_s9, 128, %s1255_s6, [#allocation4]  }
 0x75f   :  { %1028 = dma.done.wait [#allocation4], 128  }
 0x760   :  { %1029 = vsyncadd [#allocation4], 4294967168 }
 0x761   :  { %816 = vsyncpa [#allocation4], 1 }

</bundles_post_ra>
